<compile_context>
chip_gen: v7x
topology: tpu7x:2x2x1
jax: 0.10.0
libtpu: 0.0.40
codegen_flags: <defaults>
</compile_context>

<pallas_src>
import functools

import numpy as np
import jax
import jax.numpy as jnp
from jax import lax
from jax.experimental import pallas as pl
from jax.experimental.pallas import tpu as pltpu


def _metrics_kernel(logits_ref, targets_ref, out_ref, *,
                    num_buckets, num_classes, group, thresholds, thr_logit,
                    batch, block_batch):
    """Accumulate per-bucket [pair count, sum_t, sum_p, sum_tp] into out_ref.

    Block shapes: logits/targets (Bt, P//G, G*C); out (4, NB) int32, resident
    across the single "arbitrary" grid axis (accumulator pattern).
    """
    i = pl.program_id(0)

    @pl.when(i == 0)
    def _():
        out_ref[...] = jnp.zeros_like(out_ref)

    # ---- hot path: full lane utilization on the (Bt, P//G, G*C) tile -------
    tgt = targets_ref[...].astype(jnp.float32)
    # sigmoid(x) > thr  <=>  x > logit(thr)   (monotone; no EUP transcendental)
    preds = (logits_ref[...] > thr_logit).astype(jnp.float32)

    part_t = jnp.sum(tgt, axis=1)                    # (Bt, G*C)
    part_p = jnp.sum(preds, axis=1)                  # (Bt, G*C)
    part_tp = jnp.sum(tgt * preds, axis=1)           # (Bt, G*C)

    # fold the G patch sub-groups sharing the lane row -> per-class sums
    def fold(x):                                     # (Bt, G*C) -> (Bt, C)
        acc = x[:, 0:num_classes]
        for g in range(1, group):
            acc = acc + x[:, g * num_classes:(g + 1) * num_classes]
        return acc

    s_t, s_p, s_tp = fold(part_t), fold(part_p), fold(part_tp)

    # ---- ragged last block: mask rows beyond the true batch size ----------
    valid = batch - i * block_batch
    rowmask = lax.broadcasted_iota(jnp.int32, (block_batch, 1), 0) < valid
    s_t = jnp.where(rowmask, s_t, 0.0)               # also kills NaN/Inf garbage
    s_p = jnp.where(rowmask, s_p, 0.0)
    s_tp = jnp.where(rowmask, s_tp, 0.0)

    # ---- size bucket per (batch, class): count of boundaries < s_t / P -----
    # compared as s_t > boundary*P (boundary*P precomputed in float64 -> exact)
    bins = jnp.zeros(s_t.shape, jnp.int32)
    for t in thresholds:                             # static unroll, NB-1 compares
        bins = bins + (s_t > t).astype(jnp.int32)

    biota = lax.broadcasted_iota(
        jnp.int32, (block_batch, num_classes, num_buckets), 2)
    onehot = (biota == bins[:, :, None]).astype(jnp.float32)
    onehot = jnp.where(rowmask[:, :, None], onehot, 0.0)   # count excludes pad rows

    def breduce(x):                                  # (Bt, C, NB) -> (1, NB)
        return jnp.sum(jnp.sum(x, axis=0), axis=0, keepdims=True)

    # rows: [pair count, sum targets, sum preds, sum target*pred] per bucket
    upd = jnp.concatenate(
        [breduce(onehot),
         breduce(onehot * s_t[:, :, None]),
         breduce(onehot * s_p[:, :, None]),
         breduce(onehot * s_tp[:, :, None])], axis=0)       # (4, NB), exact ints

    out_ref[...] = out_ref[...] + upd.astype(jnp.int32)


def _pick_group(num_patches, num_classes):
    """Largest divisor G of P with G*C <= 128 (lane-dense tiles for small C)."""
    if num_classes >= 128:
        return 1
    gmax = max(1, 128 // num_classes)
    best = 1
    for d in range(1, min(num_patches, gmax) + 1):
        if num_patches % d == 0:
            best = d
    return best


def size_union_metrics(logits, targets, *, num_buckets=4,
                       detection_threshold=0.5):
    """Returns stacked 2x2 confusion matrices, shape (num_buckets, 2, 2)."""
    B, P, C = logits.shape
    targets = targets.reshape(B, P, C)

    thr = float(detection_threshold)
    thr_logit = float(np.log(thr) - np.log1p(-thr))          # == 0.0 for thr = 0.5
    edges = np.linspace(0.0, 1.0, num_buckets + 1)[1:-1]
    thresholds = tuple(float(np.float64(e) * P) for e in edges)

    # Free, contiguous reshapes only (no cast / transpose / padding pre-pass):
    # pack ~128 flat (patch-subgroup, class) elements onto the lane axis.
    G = _pick_group(P, C)
    logits_r = logits.reshape(B, P // G, G * C)
    targets_r = targets.reshape(B, P // G, G * C)

    # ---- batch tile size from this chip's VMEM capacity --------------------
    try:
        vmem_cap = int(pltpu.get_tpu_info().vmem_capacity_bytes)
    except Exception:
        vmem_cap = 64 * 1024 * 1024                           # conservative v7x floor
    itemsize = logits_r.dtype.itemsize + targets_r.dtype.itemsize
    live_bytes = 2 * itemsize + 12       # double-buffered inputs + f32 temporaries
    budget = int(vmem_cap * 0.4)
    bt = max(1, min(B, budget // max(1, live_bytes * P * C)))
    nblocks = pl.cdiv(B, bt)

    vmem_limit = int(min(vmem_cap * 3 // 4,
                         max(32 * 1024 * 1024,
                             live_bytes * bt * P * C + (4 << 20))))

    kernel = functools.partial(
        _metrics_kernel,
        num_buckets=num_buckets, num_classes=C, group=G,
        thresholds=thresholds, thr_logit=thr_logit,
        batch=B, block_batch=bt)

    cost = pl.CostEstimate(
        flops=int(7 * B * P * C),
        transcendentals=0,
        bytes_accessed=int(logits_r.size * logits_r.dtype.itemsize
                           + targets_r.size * targets_r.dtype.itemsize
                           + 4 * num_buckets * 4))

    out = pl.pallas_call(
        kernel,
        out_shape=jax.ShapeDtypeStruct((4, num_buckets), jnp.int32),
        grid_spec=pltpu.PrefetchScalarGridSpec(
            num_scalar_prefetch=0,
            grid=(nblocks,),
            in_specs=[
                pl.BlockSpec((bt, P // G, G * C), lambda i: (i, 0, 0)),
                pl.BlockSpec((bt, P // G, G * C), lambda i: (i, 0, 0)),
            ],
            out_specs=pl.BlockSpec((4, num_buckets), lambda i: (0, 0)),
        ),
        compiler_params=pltpu.CompilerParams(
            dimension_semantics=("arbitrary",),
            vmem_limit_bytes=vmem_limit),
        cost_estimate=cost,
    )(logits_r, targets_r)
    # TODO(synk): on v7x add a leading CORE_PARALLEL grid axis (or pl.core_map)
    # to shard the batch across the two TensorCores and sum the partials here.

    # Derive the 2x2 cells from [count, sum_t, sum_p, sum_tp] (binary targets).
    cnt, st, sp, stp = out[0], out[1], out[2], out[3]         # each (NB,), int32
    c11 = stp
    c10 = st - stp
    c01 = sp - stp
    c00 = cnt * P - st - sp + stp
    cm = jnp.stack([c00, c01, c10, c11], axis=-1).reshape(num_buckets, 2, 2)
    return cm.astype(jnp.float32)
    # TODO(synk): the torch module accumulates self.cmats across calls; this
    # returns per-call counts (add to running state outside, or alias a running
    # buffer via input_output_aliases for in-place accumulation).


def _reference(logits, targets, num_buckets, detection_threshold):
    """Pure-numpy transcription of the PyTorch forward (zero-initialized state)."""
    lg = np.asarray(logits, dtype=np.float64)
    tg = np.asarray(targets, dtype=np.float64)
    B, P, C = lg.shape
    probs = 1.0 / (1.0 + np.exp(-lg))
    preds = (probs > detection_threshold).astype(np.int64)
    buckets = np.linspace(0.0, 1.0, num_buckets + 1)
    cm = np.zeros((num_buckets, 2, 2), dtype=np.float32)
    for i in range(B):
        pct = tg[i].sum(axis=0) / P
        bins = np.searchsorted(buckets[1:-1], pct, side="left")
        for j in range(num_buckets):
            p = preds[i][:, bins == j].flatten()
            t = tg[i][:, bins == j].flatten()
            cm[j, 0, 0] += np.sum((t == 0) & (p == 0))
            cm[j, 0, 1] += np.sum((t == 0) & (p == 1))
            cm[j, 1, 0] += np.sum((t == 1) & (p == 0))
            cm[j, 1, 1] += np.sum((t == 1) & (p == 1))
    return cm


if __name__ == "__main__":
    B, P, C = 2, 16, 8          # batch, num_patches, num_classes
    NUM_BUCKETS = 4
    THRESH = 0.5

    key = jax.random.PRNGKey(0)
    k1, k2 = jax.random.split(key)
    logits = jax.random.normal(k1, (B, P, C), dtype=jnp.float32)
    targets = (jax.random.uniform(k2, (B, P, C)) > 0.6).astype(jnp.float32)

    cmats = size_union_metrics(
        logits, targets, num_buckets=NUM_BUCKETS, detection_threshold=THRESH)
    cmats = jax.block_until_ready(cmats)

    ref = _reference(logits, targets, NUM_BUCKETS, THRESH)
    np.testing.assert_allclose(np.asarray(cmats), ref, rtol=0, atol=0)
    print("KERNEL_OK")
</pallas_src>

<mosaic_0001>
module attributes {stable_mosaic.version = 11 : i64} {
  func.func @_metrics_kernel(%arg0: i32, %arg1: memref<2x1x128xf32, #tpu.memory_space<vmem>>, %arg2: memref<2x1x128xf32, #tpu.memory_space<vmem>>, %arg3: memref<4x4xi32, #tpu.memory_space<vmem>>) attributes {dimension_semantics = [#tpu.dimension_semantics<arbitrary>], iteration_bounds = array<i64: 1>, scalar_prefetch = 0 : i64, scratch_operands = 0 : i64, tpu.core_type = #tpu.core_type<tc>, window_params = [{transform_indices = @transform_0, window_bounds = array<i64: 2, 1, 128>}, {transform_indices = @transform_1, window_bounds = array<i64: 2, 1, 128>}, {pipeline_mode = #tpu.pipeline_mode<synchronous>, transform_indices = @transform_2, window_bounds = array<i64: 4, 4>}]} {
    %c0_i32 = arith.constant 0 : i32
    %0 = arith.cmpi eq, %arg0, %c0_i32 : i32
    %1 = arith.extui %0 : i1 to i32
    %c0_i32_0 = arith.constant 0 : i32
    %2 = arith.cmpi ne, %1, %c0_i32_0 : i32
    scf.if %2 {
      %c0_i32_30 = arith.constant 0 : i32
      %173 = vector.broadcast %c0_i32_30 : i32 to vector<4x4xi32>
      %c0_31 = arith.constant 0 : index
      %c0_32 = arith.constant 0 : index
      %174 = vector.load %arg3[%c0_31, %c0_32] : memref<4x4xi32, #tpu.memory_space<vmem>>, vector<4x4xi32>
      tpu.vector_store %arg3[%c0_31, %c0_32], %173 {strides = array<i32>} : memref<4x4xi32, #tpu.memory_space<vmem>>, vector<4x4xi32>,
    } else {
    }
    %c0 = arith.constant 0 : index
    %c0_1 = arith.constant 0 : index
    %c0_2 = arith.constant 0 : index
    %3 = vector.load %arg2[%c0, %c0_1, %c0_2] : memref<2x1x128xf32, #tpu.memory_space<vmem>>, vector<2x1x128xf32>
    %c0_3 = arith.constant 0 : index
    %c0_4 = arith.constant 0 : index
    %c0_5 = arith.constant 0 : index
    %4 = vector.load %arg1[%c0_3, %c0_4, %c0_5] : memref<2x1x128xf32, #tpu.memory_space<vmem>>, vector<2x1x128xf32>
    %cst = arith.constant 0.000000e+00 : f32
    %5 = vector.broadcast %cst : f32 to vector<2x1x128xf32>
    %6 = arith.cmpf ogt, %4, %5 : vector<2x1x128xf32>
    %7 = arith.extui %6 : vector<2x1x128xi1> to vector<2x1x128xi32>
    %8 = arith.sitofp %7 : vector<2x1x128xi32> to vector<2x1x128xf32>
    %cst_6 = arith.constant dense<0.000000e+00> : vector<2x128xf32>
    %9 = vector.multi_reduction <add>, %3, %cst_6 [1] : vector<2x1x128xf32> to vector<2x128xf32>
    %cst_7 = arith.constant dense<0.000000e+00> : vector<2x128xf32>
    %10 = vector.multi_reduction <add>, %8, %cst_7 [1] : vector<2x1x128xf32> to vector<2x128xf32>
    %11 = arith.mulf %3, %8 : vector<2x1x128xf32>
    %cst_8 = arith.constant dense<0.000000e+00> : vector<2x128xf32>
    %12 = vector.multi_reduction <add>, %11, %cst_8 [1] : vector<2x1x128xf32> to vector<2x128xf32>
    %13 = vector.extract_strided_slice %9 {offsets = [0, 0], sizes = [2, 8], strides = [1, 1]} : vector<2x128xf32> to vector<2x8xf32>
    %14 = vector.extract_strided_slice %9 {offsets = [0, 8], sizes = [2, 8], strides = [1, 1]} : vector<2x128xf32> to vector<2x8xf32>
    %15 = arith.addf %13, %14 : vector<2x8xf32>
    %16 = vector.extract_strided_slice %9 {offsets = [0, 16], sizes = [2, 8], strides = [1, 1]} : vector<2x128xf32> to vector<2x8xf32>
    %17 = arith.addf %15, %16 : vector<2x8xf32>
    %18 = vector.extract_strided_slice %9 {offsets = [0, 24], sizes = [2, 8], strides = [1, 1]} : vector<2x128xf32> to vector<2x8xf32>
    %19 = arith.addf %17, %18 : vector<2x8xf32>
    %20 = vector.extract_strided_slice %9 {offsets = [0, 32], sizes = [2, 8], strides = [1, 1]} : vector<2x128xf32> to vector<2x8xf32>
    %21 = arith.addf %19, %20 : vector<2x8xf32>
    %22 = vector.extract_strided_slice %9 {offsets = [0, 40], sizes = [2, 8], strides = [1, 1]} : vector<2x128xf32> to vector<2x8xf32>
    %23 = arith.addf %21, %22 : vector<2x8xf32>
    %24 = vector.extract_strided_slice %9 {offsets = [0, 48], sizes = [2, 8], strides = [1, 1]} : vector<2x128xf32> to vector<2x8xf32>
    %25 = arith.addf %23, %24 : vector<2x8xf32>
    %26 = vector.extract_strided_slice %9 {offsets = [0, 56], sizes = [2, 8], strides = [1, 1]} : vector<2x128xf32> to vector<2x8xf32>
    %27 = arith.addf %25, %26 : vector<2x8xf32>
    %28 = vector.extract_strided_slice %9 {offsets = [0, 64], sizes = [2, 8], strides = [1, 1]} : vector<2x128xf32> to vector<2x8xf32>
    %29 = arith.addf %27, %28 : vector<2x8xf32>
    %30 = vector.extract_strided_slice %9 {offsets = [0, 72], sizes = [2, 8], strides = [1, 1]} : vector<2x128xf32> to vector<2x8xf32>
    %31 = arith.addf %29, %30 : vector<2x8xf32>
    %32 = vector.extract_strided_slice %9 {offsets = [0, 80], sizes = [2, 8], strides = [1, 1]} : vector<2x128xf32> to vector<2x8xf32>
    %33 = arith.addf %31, %32 : vector<2x8xf32>
    %34 = vector.extract_strided_slice %9 {offsets = [0, 88], sizes = [2, 8], strides = [1, 1]} : vector<2x128xf32> to vector<2x8xf32>
    %35 = arith.addf %33, %34 : vector<2x8xf32>
    %36 = vector.extract_strided_slice %9 {offsets = [0, 96], sizes = [2, 8], strides = [1, 1]} : vector<2x128xf32> to vector<2x8xf32>
    %37 = arith.addf %35, %36 : vector<2x8xf32>
    %38 = vector.extract_strided_slice %9 {offsets = [0, 104], sizes = [2, 8], strides = [1, 1]} : vector<2x128xf32> to vector<2x8xf32>
    %39 = arith.addf %37, %38 : vector<2x8xf32>
    %40 = vector.extract_strided_slice %9 {offsets = [0, 112], sizes = [2, 8], strides = [1, 1]} : vector<2x128xf32> to vector<2x8xf32>
    %41 = arith.addf %39, %40 : vector<2x8xf32>
    %42 = vector.extract_strided_slice %9 {offsets = [0, 120], sizes = [2, 8], strides = [1, 1]} : vector<2x128xf32> to vector<2x8xf32>
    %43 = arith.addf %41, %42 : vector<2x8xf32>
    %44 = vector.extract_strided_slice %10 {offsets = [0, 0], sizes = [2, 8], strides = [1, 1]} : vector<2x128xf32> to vector<2x8xf32>
    %45 = vector.extract_strided_slice %10 {offsets = [0, 8], sizes = [2, 8], strides = [1, 1]} : vector<2x128xf32> to vector<2x8xf32>
    %46 = arith.addf %44, %45 : vector<2x8xf32>
    %47 = vector.extract_strided_slice %10 {offsets = [0, 16], sizes = [2, 8], strides = [1, 1]} : vector<2x128xf32> to vector<2x8xf32>
    %48 = arith.addf %46, %47 : vector<2x8xf32>
    %49 = vector.extract_strided_slice %10 {offsets = [0, 24], sizes = [2, 8], strides = [1, 1]} : vector<2x128xf32> to vector<2x8xf32>
    %50 = arith.addf %48, %49 : vector<2x8xf32>
    %51 = vector.extract_strided_slice %10 {offsets = [0, 32], sizes = [2, 8], strides = [1, 1]} : vector<2x128xf32> to vector<2x8xf32>
    %52 = arith.addf %50, %51 : vector<2x8xf32>
    %53 = vector.extract_strided_slice %10 {offsets = [0, 40], sizes = [2, 8], strides = [1, 1]} : vector<2x128xf32> to vector<2x8xf32>
    %54 = arith.addf %52, %53 : vector<2x8xf32>
    %55 = vector.extract_strided_slice %10 {offsets = [0, 48], sizes = [2, 8], strides = [1, 1]} : vector<2x128xf32> to vector<2x8xf32>
    %56 = arith.addf %54, %55 : vector<2x8xf32>
    %57 = vector.extract_strided_slice %10 {offsets = [0, 56], sizes = [2, 8], strides = [1, 1]} : vector<2x128xf32> to vector<2x8xf32>
    %58 = arith.addf %56, %57 : vector<2x8xf32>
    %59 = vector.extract_strided_slice %10 {offsets = [0, 64], sizes = [2, 8], strides = [1, 1]} : vector<2x128xf32> to vector<2x8xf32>
    %60 = arith.addf %58, %59 : vector<2x8xf32>
    %61 = vector.extract_strided_slice %10 {offsets = [0, 72], sizes = [2, 8], strides = [1, 1]} : vector<2x128xf32> to vector<2x8xf32>
    %62 = arith.addf %60, %61 : vector<2x8xf32>
    %63 = vector.extract_strided_slice %10 {offsets = [0, 80], sizes = [2, 8], strides = [1, 1]} : vector<2x128xf32> to vector<2x8xf32>
    %64 = arith.addf %62, %63 : vector<2x8xf32>
    %65 = vector.extract_strided_slice %10 {offsets = [0, 88], sizes = [2, 8], strides = [1, 1]} : vector<2x128xf32> to vector<2x8xf32>
    %66 = arith.addf %64, %65 : vector<2x8xf32>
    %67 = vector.extract_strided_slice %10 {offsets = [0, 96], sizes = [2, 8], strides = [1, 1]} : vector<2x128xf32> to vector<2x8xf32>
    %68 = arith.addf %66, %67 : vector<2x8xf32>
    %69 = vector.extract_strided_slice %10 {offsets = [0, 104], sizes = [2, 8], strides = [1, 1]} : vector<2x128xf32> to vector<2x8xf32>
    %70 = arith.addf %68, %69 : vector<2x8xf32>
    %71 = vector.extract_strided_slice %10 {offsets = [0, 112], sizes = [2, 8], strides = [1, 1]} : vector<2x128xf32> to vector<2x8xf32>
    %72 = arith.addf %70, %71 : vector<2x8xf32>
    %73 = vector.extract_strided_slice %10 {offsets = [0, 120], sizes = [2, 8], strides = [1, 1]} : vector<2x128xf32> to vector<2x8xf32>
    %74 = arith.addf %72, %73 : vector<2x8xf32>
    %75 = vector.extract_strided_slice %12 {offsets = [0, 0], sizes = [2, 8], strides = [1, 1]} : vector<2x128xf32> to vector<2x8xf32>
    %76 = vector.extract_strided_slice %12 {offsets = [0, 8], sizes = [2, 8], strides = [1, 1]} : vector<2x128xf32> to vector<2x8xf32>
    %77 = arith.addf %75, %76 : vector<2x8xf32>
    %78 = vector.extract_strided_slice %12 {offsets = [0, 16], sizes = [2, 8], strides = [1, 1]} : vector<2x128xf32> to vector<2x8xf32>
    %79 = arith.addf %77, %78 : vector<2x8xf32>
    %80 = vector.extract_strided_slice %12 {offsets = [0, 24], sizes = [2, 8], strides = [1, 1]} : vector<2x128xf32> to vector<2x8xf32>
    %81 = arith.addf %79, %80 : vector<2x8xf32>
    %82 = vector.extract_strided_slice %12 {offsets = [0, 32], sizes = [2, 8], strides = [1, 1]} : vector<2x128xf32> to vector<2x8xf32>
    %83 = arith.addf %81, %82 : vector<2x8xf32>
    %84 = vector.extract_strided_slice %12 {offsets = [0, 40], sizes = [2, 8], strides = [1, 1]} : vector<2x128xf32> to vector<2x8xf32>
    %85 = arith.addf %83, %84 : vector<2x8xf32>
    %86 = vector.extract_strided_slice %12 {offsets = [0, 48], sizes = [2, 8], strides = [1, 1]} : vector<2x128xf32> to vector<2x8xf32>
    %87 = arith.addf %85, %86 : vector<2x8xf32>
    %88 = vector.extract_strided_slice %12 {offsets = [0, 56], sizes = [2, 8], strides = [1, 1]} : vector<2x128xf32> to vector<2x8xf32>
    %89 = arith.addf %87, %88 : vector<2x8xf32>
    %90 = vector.extract_strided_slice %12 {offsets = [0, 64], sizes = [2, 8], strides = [1, 1]} : vector<2x128xf32> to vector<2x8xf32>
    %91 = arith.addf %89, %90 : vector<2x8xf32>
    %92 = vector.extract_strided_slice %12 {offsets = [0, 72], sizes = [2, 8], strides = [1, 1]} : vector<2x128xf32> to vector<2x8xf32>
    %93 = arith.addf %91, %92 : vector<2x8xf32>
    %94 = vector.extract_strided_slice %12 {offsets = [0, 80], sizes = [2, 8], strides = [1, 1]} : vector<2x128xf32> to vector<2x8xf32>
    %95 = arith.addf %93, %94 : vector<2x8xf32>
    %96 = vector.extract_strided_slice %12 {offsets = [0, 88], sizes = [2, 8], strides = [1, 1]} : vector<2x128xf32> to vector<2x8xf32>
    %97 = arith.addf %95, %96 : vector<2x8xf32>
    %98 = vector.extract_strided_slice %12 {offsets = [0, 96], sizes = [2, 8], strides = [1, 1]} : vector<2x128xf32> to vector<2x8xf32>
    %99 = arith.addf %97, %98 : vector<2x8xf32>
    %100 = vector.extract_strided_slice %12 {offsets = [0, 104], sizes = [2, 8], strides = [1, 1]} : vector<2x128xf32> to vector<2x8xf32>
    %101 = arith.addf %99, %100 : vector<2x8xf32>
    %102 = vector.extract_strided_slice %12 {offsets = [0, 112], sizes = [2, 8], strides = [1, 1]} : vector<2x128xf32> to vector<2x8xf32>
    %103 = arith.addf %101, %102 : vector<2x8xf32>
    %104 = vector.extract_strided_slice %12 {offsets = [0, 120], sizes = [2, 8], strides = [1, 1]} : vector<2x128xf32> to vector<2x8xf32>
    %105 = arith.addf %103, %104 : vector<2x8xf32>
    %c2_i32 = arith.constant 2 : i32
    %106 = arith.muli %arg0, %c2_i32 : i32
    %c2_i32_9 = arith.constant 2 : i32
    %107 = arith.subi %c2_i32_9, %106 : i32
    %108 = tpu.iota {dimensions = array<i32: 0>} : vector<2x1xi32>
    %109 = vector.broadcast %107 : i32 to vector<2x1xi32>
    %110 = arith.cmpi slt, %108, %109 : vector<2x1xi32>
    %cst_10 = arith.constant 0.000000e+00 : f32
    %111 = vector.shape_cast %110 : vector<2x1xi1> to vector<2x1xi1>
    %112 = vector.broadcast %111 : vector<2x1xi1> to vector<2x8xi1>
    %113 = vector.broadcast %cst_10 : f32 to vector<2x8xf32>
    %114 = arith.select %112, %43, %113 : vector<2x8xi1>, vector<2x8xf32>
    %cst_11 = arith.constant 0.000000e+00 : f32
    %115 = vector.shape_cast %110 : vector<2x1xi1> to vector<2x1xi1>
    %116 = vector.broadcast %115 : vector<2x1xi1> to vector<2x8xi1>
    %117 = vector.broadcast %cst_11 : f32 to vector<2x8xf32>
    %118 = arith.select %116, %74, %117 : vector<2x8xi1>, vector<2x8xf32>
    %cst_12 = arith.constant 0.000000e+00 : f32
    %119 = vector.shape_cast %110 : vector<2x1xi1> to vector<2x1xi1>
    %120 = vector.broadcast %119 : vector<2x1xi1> to vector<2x8xi1>
    %121 = vector.broadcast %cst_12 : f32 to vector<2x8xf32>
    %122 = arith.select %120, %105, %121 : vector<2x8xi1>, vector<2x8xf32>
    %c0_i32_13 = arith.constant 0 : i32
    %123 = vector.broadcast %c0_i32_13 : i32 to vector<2x8xi32>
    %cst_14 = arith.constant 4.000000e+00 : f32
    %124 = vector.broadcast %cst_14 : f32 to vector<2x8xf32>
    %125 = arith.cmpf ogt, %114, %124 : vector<2x8xf32>
    %126 = arith.extui %125 : vector<2x8xi1> to vector<2x8xi32>
    %127 = arith.addi %123, %126 : vector<2x8xi32>
    %cst_15 = arith.constant 8.000000e+00 : f32
    %128 = vector.broadcast %cst_15 : f32 to vector<2x8xf32>
    %129 = arith.cmpf ogt, %114, %128 : vector<2x8xf32>
    %130 = arith.extui %129 : vector<2x8xi1> to vector<2x8xi32>
    %131 = arith.addi %127, %130 : vector<2x8xi32>
    %cst_16 = arith.constant 1.200000e+01 : f32
    %132 = vector.broadcast %cst_16 : f32 to vector<2x8xf32>
    %133 = arith.cmpf ogt, %114, %132 : vector<2x8xf32>
    %134 = arith.extui %133 : vector<2x8xi1> to vector<2x8xi32>
    %135 = arith.addi %131, %134 : vector<2x8xi32>
    %136 = tpu.iota {dimensions = array<i32: 2>} : vector<2x8x4xi32>
    %137 = vector.shape_cast %135 : vector<2x8xi32> to vector<2x8x1xi32>
    %138 = vector.broadcast %137 : vector<2x8x1xi32> to vector<2x8x4xi32>
    %139 = arith.cmpi eq, %136, %138 : vector<2x8x4xi32>
    %140 = arith.extui %139 : vector<2x8x4xi1> to vector<2x8x4xi32>
    %141 = arith.sitofp %140 : vector<2x8x4xi32> to vector<2x8x4xf32>
    %142 = vector.shape_cast %110 : vector<2x1xi1> to vector<2x1x1xi1>
    %cst_17 = arith.constant 0.000000e+00 : f32
    %143 = vector.shape_cast %142 : vector<2x1x1xi1> to vector<2x1x1xi1>
    %144 = vector.broadcast %143 : vector<2x1x1xi1> to vector<2x8x4xi1>
    %145 = vector.broadcast %cst_17 : f32 to vector<2x8x4xf32>
    %146 = arith.select %144, %141, %145 : vector<2x8x4xi1>, vector<2x8x4xf32>
    %cst_18 = arith.constant dense<0.000000e+00> : vector<8x4xf32>
    %147 = vector.multi_reduction <add>, %146, %cst_18 [0] : vector<2x8x4xf32> to vector<8x4xf32>
    %cst_19 = arith.constant dense<0.000000e+00> : vector<4xf32>
    %148 = vector.multi_reduction <add>, %147, %cst_19 [0] : vector<8x4xf32> to vector<4xf32>
    %149 = vector.shape_cast %148 : vector<4xf32> to vector<1x4xf32>
    %150 = vector.shape_cast %114 : vector<2x8xf32> to vector<2x8x1xf32>
    %151 = vector.broadcast %150 : vector<2x8x1xf32> to vector<2x8x4xf32>
    %152 = arith.mulf %146, %151 : vector<2x8x4xf32>
    %cst_20 = arith.constant dense<0.000000e+00> : vector<8x4xf32>
    %153 = vector.multi_reduction <add>, %152, %cst_20 [0] : vector<2x8x4xf32> to vector<8x4xf32>
    %cst_21 = arith.constant dense<0.000000e+00> : vector<4xf32>
    %154 = vector.multi_reduction <add>, %153, %cst_21 [0] : vector<8x4xf32> to vector<4xf32>
    %155 = vector.shape_cast %154 : vector<4xf32> to vector<1x4xf32>
    %156 = vector.shape_cast %118 : vector<2x8xf32> to vector<2x8x1xf32>
    %157 = vector.broadcast %156 : vector<2x8x1xf32> to vector<2x8x4xf32>
    %158 = arith.mulf %146, %157 : vector<2x8x4xf32>
    %cst_22 = arith.constant dense<0.000000e+00> : vector<8x4xf32>
    %159 = vector.multi_reduction <add>, %158, %cst_22 [0] : vector<2x8x4xf32> to vector<8x4xf32>
    %cst_23 = arith.constant dense<0.000000e+00> : vector<4xf32>
    %160 = vector.multi_reduction <add>, %159, %cst_23 [0] : vector<8x4xf32> to vector<4xf32>
    %161 = vector.shape_cast %160 : vector<4xf32> to vector<1x4xf32>
    %162 = vector.shape_cast %122 : vector<2x8xf32> to vector<2x8x1xf32>
    %163 = vector.broadcast %162 : vector<2x8x1xf32> to vector<2x8x4xf32>
    %164 = arith.mulf %146, %163 : vector<2x8x4xf32>
    %cst_24 = arith.constant dense<0.000000e+00> : vector<8x4xf32>
    %165 = vector.multi_reduction <add>, %164, %cst_24 [0] : vector<2x8x4xf32> to vector<8x4xf32>
    %cst_25 = arith.constant dense<0.000000e+00> : vector<4xf32>
    %166 = vector.multi_reduction <add>, %165, %cst_25 [0] : vector<8x4xf32> to vector<4xf32>
    %167 = vector.shape_cast %166 : vector<4xf32> to vector<1x4xf32>
    %168 = tpu.concatenate %149, %155, %161, %167 in 0 : vector<1x4xf32>, vector<1x4xf32>, vector<1x4xf32>, vector<1x4xf32> -> vector<4x4xf32>
    %c0_26 = arith.constant 0 : index
    %c0_27 = arith.constant 0 : index
    %169 = vector.load %arg3[%c0_26, %c0_27] : memref<4x4xi32, #tpu.memory_space<vmem>>, vector<4x4xi32>
    %170 = arith.fptosi %168 : vector<4x4xf32> to vector<4x4xi32>
    %171 = arith.addi %169, %170 : vector<4x4xi32>
    %c0_28 = arith.constant 0 : index
    %c0_29 = arith.constant 0 : index
    %172 = vector.load %arg3[%c0_28, %c0_29] : memref<4x4xi32, #tpu.memory_space<vmem>>, vector<4x4xi32>
    tpu.vector_store %arg3[%c0_28, %c0_29], %171 {strides = array<i32>} : memref<4x4xi32, #tpu.memory_space<vmem>>, vector<4x4xi32>,
    return
  }
  func.func @transform_0(%arg0: i32) -> (i32, i32, i32) {
    %c0_i32 = arith.constant 0 : i32
    %c0_i32_0 = arith.constant 0 : i32
    %c0_i32_1 = arith.constant 0 : i32
    return %arg0, %c0_i32, %c0_i32_0 : i32, i32, i32
  }
  func.func @transform_1(%arg0: i32) -> (i32, i32, i32) {
    %c0_i32 = arith.constant 0 : i32
    %c0_i32_0 = arith.constant 0 : i32
    %c0_i32_1 = arith.constant 0 : i32
    return %arg0, %c0_i32, %c0_i32_0 : i32, i32, i32
  }
  func.func @transform_2(%arg0: i32) -> (i32, i32) {
    %c0_i32 = arith.constant 0 : i32
    %c0_i32_0 = arith.constant 0 : i32
    %c0_i32_1 = arith.constant 0 : i32
    return %c0_i32, %c0_i32_0 : i32, i32
  }
}

</mosaic_0001>

<bundles_post_ra>
// kernel: tpu_custom_call.1
= control target key start
LH: loop header
LB: loop body
LE: loop exit
PB: predicated region body
PF: predicated region fallthrough
CT: control target
= control target key end

     0   :  { %7 = vsyncpa [#allocation3], 0  ;;  %s1194_s0 = inlined_call_operand.hbm [shape: f32[2,1,128], index: 0, kind: input, shape index: {}]   ;;  %s1195_s1 = inlined_call_operand.vmem [shape: f32[2,1,128], index: 1, kind: input, shape index: {}]   ;;  %s1196_s2 = inlined_call_operand.hbm [shape: s32[4,4], index: 2, kind: output, shape index: {}]  }
   0x1   :  { %8 = vsyncpa [#allocation4], 0  ;;  %s822_s9 = smov [#allocation2]   ;;  %s774_s13 = scalar_lea.hbm %s1194_s0, 32 }
   0x2   :  { %s14_s10 = sshll.u32 %s822_s9, 4  ;;  %p775_p0 = scmp.ne.s32.totalorder %s1194_s0, %s774_s13  ;;  %s15_s10 = int_to_ptr.vmem [resolvable:$true] %s14_s10 }
   0x3   :  { %p778_p1 = scmp.lt.u32.totalorder %s774_s13, %s1194_s0 }
   0x5   :  { %p780_p2 = pnand %p778_p1, %p775_p0 }
   0x7   :  { %783 = shalt.err (!%p780_p2)
}
   0x8   :  { %s784_s18 = scalar_lea.vmem %s15_s10, 32  ;;  %p789_p4 = scmp.lt.s32.totalorder %s15_s10, %s15_s10 }
   0x9   :  { %p785_p3 = scmp.ne.s32.totalorder %s15_s10, %s784_s18  ;;  %p790_p5 = scmp.lt.s32.totalorder %s784_s18, %s784_s18 }
   0xb   :  { %p791_p6 = por %p790_p5, %p789_p4 }
   0xd   :  { %p792_p7 = pnand %p791_p6, %p785_p3 }
   0xf   :  { %795 = shalt.err (!%p792_p7)
}
  0x10   :  { %s823_s19 = smov 16   ;;  %s824_s20 = smov 1  }
  0x11   :  { %20 = dma.hbm_to_vmem [thread:$0]  %s1194_s0, 32, %s15_s10, [#allocation3], %s823_s19, %s823_s19, %s824_s20  }
  0x12   :  { %818 = dma.done.wait [#allocation3], 32  }
  0x13   :  { %819 = vsyncadd [#allocation3], 4294967264  ;;  %v875_v0 = vld [vmem:[%s1195_s1] sm:$0x1]  ;;  %s825_s25 = smov 112   ;;  %s826_s26 = smov 120  }
  0x14   :  { %60 = vrot.lane.b32.xlu1 %v875_v0, %s825_s25  ;;  %52 = vrot.lane.b32.xlu0 %v875_v0, %s826_s26  ;;  %v883_v1 = vld [vmem:[%s1195_s1 + $0x1] sm:$0x1]  ;;  %s827_s0 = smov 104   ;;  %v34_v2 = vld [vmem:[#allocation2] sm:$0x1]  ;;  %s828_s29 = smov 96  }
  0x15   :  { %v35_v3 = vld [vmem:[#allocation2 + $0x1] sm:$0x1]  ;;  %vm36_vm0 = vcmp.gt.f32.partialorder %v34_v2, 0.0  ;;  %s829_s1 = smov 88   ;;  %v830_v4 = vmov 0.0   ;;  %s831_s30 = smov 80  }
  0x16   :  { %vm37_vm1 = vcmp.gt.f32.partialorder %v35_v3, 0.0  ;;  %v901_v5 = vsel %vm36_vm0, 1.0, %v830_v4  ;;  %s832_s3 = smov 72   ;;  %s833_s4 = smov 64   ;;  %vm30_vm6 = vcmask 27648   ;;  %vm527_vm9 = vcmask 31744  }
  0x17   :  { %v904_v6 = vsel %vm37_vm1, 1.0, %v830_v4  ;;  %v916_v8 = vmul.f32 %v901_v5, %v875_v0  ;;  %s834_s5 = smov 56   ;;  %s835_s6 = smov 48   ;;  %vm616_vm12 = vcmask 1040384   ;;  %vm618_vm13 = vcmask 1041408  }
  0x18   :  { %62 = vrot.lane.b32.xlu1 %v883_v1, %s825_s25  ;;  %54 = vrot.lane.b32.xlu0 %v883_v1, %s826_s26  ;;  %v912_v7 = vpack.i.bf16 %v904_v6, %v901_v5  ;;  %v922_v9 = vmul.f32 %v904_v6, %v883_v1  ;;  %s836_s7 = smov 40   ;;  %s837_s8 = smov 32   ;;  %vm620_vm14 = vcmask 1042432  }
  0x19   :  { %s838_s9 = smov 24   ;;  %s839_s10 = smov 8  }
  0x1a   :  { %s842_s11 = smov [#allocation5]  }
  0x1b   :  { %s633_s12 = sshll.u32 %s842_s11, 4  ;;  %s634_s12 = int_to_ptr.vmem [resolvable:$true] %s633_s12 }
  0x1c   :  { %70 = vrot.lane.b32.xlu1 %v883_v1, %s827_s0  ;;  %68 = vrot.lane.b32.xlu0 %v875_v0, %s827_s0  ;;  %s796_s13 = scalar_lea.vmem %s634_s12, 64  ;;  %p801_p9 = scmp.lt.s32.totalorder %s634_s12, %s634_s12 }
  0x1d   :  { %p797_p8 = scmp.ne.s32.totalorder %s634_s12, %s796_s13  ;;  %p802_p10 = scmp.lt.s32.totalorder %s796_s13, %s796_s13 }
  0x1f   :  { %p803_p11 = por %p802_p10, %p801_p9 }
  0x20   :  { %78 = vrot.lane.b32.xlu1 %v883_v1, %s828_s29  ;;  %76 = vrot.lane.b32.xlu0 %v875_v0, %s828_s29 }
  0x21   :  { %p804_p12 = pnand %p803_p11, %p797_p8 }
  0x24   :  { %86 = vrot.lane.b32.xlu1 %v883_v1, %s829_s1  ;;  %84 = vrot.lane.b32.xlu0 %v875_v0, %s829_s1 }
  0x28   :  { %94 = vrot.lane.b32.xlu1 %v883_v1, %s831_s30  ;;  %92 = vrot.lane.b32.xlu0 %v875_v0, %s831_s30 }
  0x2c   :  { %670 = vrot.lane.b32.xlu0 %v912_v7, %s826_s26  ;;  %296 = vrot.lane.b32.xlu1 %v916_v8, %s826_s26 }
  0x30   :  { %298 = vrot.lane.b32.xlu0 %v922_v9, %s826_s26  ;;  %100 = vrot.lane.b32.xlu1 %v875_v0, %s832_s3 }
  0x34   :  { %102 = vrot.lane.b32.xlu0 %v883_v1, %s832_s3  ;;  %675 = vrot.lane.b32.xlu1 %v912_v7, %s825_s25 }
  0x38   :  { %304 = vrot.lane.b32.xlu0 %v916_v8, %s825_s25  ;;  %306 = vrot.lane.b32.xlu1 %v922_v9, %s825_s25 }
  0x3c   :  { %108 = vrot.lane.b32.xlu0 %v875_v0, %s833_s4  ;;  %110 = vrot.lane.b32.xlu1 %v883_v1, %s833_s4 }
  0x40   :  { %680 = vrot.lane.b32.xlu0 %v912_v7, %s827_s0  ;;  %312 = vrot.lane.b32.xlu1 %v916_v8, %s827_s0 }
  0x44   :  { %314 = vrot.lane.b32.xlu0 %v922_v9, %s827_s0  ;;  %116 = vrot.lane.b32.xlu1 %v875_v0, %s834_s5 }
  0x48   :  { %118 = vrot.lane.b32.xlu0 %v883_v1, %s834_s5  ;;  %685 = vrot.lane.b32.xlu1 %v912_v7, %s828_s29 }
  0x4c   :  { %320 = vrot.lane.b32.xlu0 %v916_v8, %s828_s29  ;;  %322 = vrot.lane.b32.xlu1 %v922_v9, %s828_s29 }
  0x50   :  { %124 = vrot.lane.b32.xlu0 %v875_v0, %s835_s6  ;;  %126 = vrot.lane.b32.xlu1 %v883_v1, %s835_s6 }
  0x54   :  { %690 = vrot.lane.b32.xlu0 %v912_v7, %s829_s1  ;;  %328 = vrot.lane.b32.xlu1 %v916_v8, %s829_s1 }
  0x58   :  { %330 = vrot.lane.b32.xlu0 %v922_v9, %s829_s1  ;;  %132 = vrot.lane.b32.xlu1 %v875_v0, %s836_s7 }
  0x5c   :  { %134 = vrot.lane.b32.xlu0 %v883_v1, %s836_s7  ;;  %695 = vrot.lane.b32.xlu1 %v912_v7, %s831_s30 }
  0x60   :  { %336 = vrot.lane.b32.xlu0 %v916_v8, %s831_s30  ;;  %338 = vrot.lane.b32.xlu1 %v922_v9, %s831_s30 }
  0x64   :  { %140 = vrot.lane.b32.xlu0 %v875_v0, %s837_s8  ;;  %142 = vrot.lane.b32.xlu1 %v883_v1, %s837_s8 }
  0x68   :  { %700 = vrot.lane.b32.xlu0 %v912_v7, %s832_s3  ;;  %344 = vrot.lane.b32.xlu1 %v916_v8, %s832_s3 }
  0x6c   :  { %346 = vrot.lane.b32.xlu0 %v922_v9, %s832_s3  ;;  %148 = vrot.lane.b32.xlu1 %v875_v0, %s838_s9 }
  0x70   :  { %150 = vrot.lane.b32.xlu0 %v883_v1, %s838_s9  ;;  %705 = vrot.lane.b32.xlu1 %v912_v7, %s833_s4 }
  0x74   :  { %352 = vrot.lane.b32.xlu0 %v916_v8, %s833_s4  ;;  %354 = vrot.lane.b32.xlu1 %v922_v9, %s833_s4 }
  0x78   :  { %156 = vrot.lane.b32.xlu0 %v875_v0, %s823_s19  ;;  %158 = vrot.lane.b32.xlu1 %v883_v1, %s823_s19 }
  0x7c   :  { %710 = vrot.lane.b32.xlu0 %v912_v7, %s834_s5  ;;  %360 = vrot.lane.b32.xlu1 %v916_v8, %s834_s5 }
  0x80   :  { %362 = vrot.lane.b32.xlu0 %v922_v9, %s834_s5  ;;  %164 = vrot.lane.b32.xlu1 %v875_v0, %s839_s10 }
  0x84   :  { %166 = vrot.lane.b32.xlu0 %v883_v1, %s839_s10  ;;  %715 = vrot.lane.b32.xlu1 %v912_v7, %s835_s6 }
  0x86   :  { %v61_v10 = vpop.permute.xlu1 %60  ;;  %v53_v11 = vpop.permute.xlu0 %52 }
  0x87   :  { %v58_v12 = vadd.f32 %v53_v11, %v875_v0 }
  0x88   :  { %368 = vrot.lane.b32.xlu0 %v916_v8, %s835_s6  ;;  %370 = vrot.lane.b32.xlu1 %v922_v9, %s835_s6 }
  0x89   :  { %v66_v13 = vadd.f32 %v61_v10, %v58_v12 }
  0x8a   :  { %v63_v14 = vpop.permute.xlu1 %62  ;;  %v55_v15 = vpop.permute.xlu0 %54 }
  0x8b   :  { %v59_v16 = vadd.f32 %v55_v15, %v883_v1 }
  0x8c   :  { %720 = vrot.lane.b32.xlu0 %v912_v7, %s836_s7  ;;  %376 = vrot.lane.b32.xlu1 %v916_v8, %s836_s7 }
  0x8d   :  { %v67_v17 = vadd.f32 %v63_v14, %v59_v16 }
  0x8e   :  { %v71_v18 = vpop.permute.xlu1 %70  ;;  %v69_v19 = vpop.permute.xlu0 %68 }
  0x8f   :  { %v75_v20 = vadd.f32 %v71_v18, %v67_v17  ;;  %v74_v21 = vadd.f32 %v69_v19, %v66_v13 }
  0x90   :  { %378 = vrot.lane.b32.xlu0 %v922_v9, %s836_s7  ;;  %725 = vrot.lane.b32.xlu1 %v912_v7, %s837_s8 }
  0x92   :  { %v79_v22 = vpop.permute.xlu1 %78  ;;  %v77_v23 = vpop.permute.xlu0 %76 }
  0x93   :  { %v83_v24 = vadd.f32 %v79_v22, %v75_v20  ;;  %v82_v25 = vadd.f32 %v77_v23, %v74_v21 }
  0x94   :  { %384 = vrot.lane.b32.xlu0 %v916_v8, %s837_s8  ;;  %386 = vrot.lane.b32.xlu1 %v922_v9, %s837_s8 }
  0x96   :  { %v87_v26 = vpop.permute.xlu1 %86  ;;  %v85_v27 = vpop.permute.xlu0 %84 }
  0x97   :  { %v91_v28 = vadd.f32 %v87_v26, %v83_v24  ;;  %v90_v29 = vadd.f32 %v85_v27, %v82_v25 }
  0x98   :  { %730 = vrot.lane.b32.xlu0 %v912_v7, %s838_s9  ;;  %392 = vrot.lane.b32.xlu1 %v916_v8, %s838_s9 }
  0x9a   :  { %v95_v30 = vpop.permute.xlu1 %94  ;;  %v93_v31 = vpop.permute.xlu0 %92 }
  0x9b   :  { %v99_v32 = vadd.f32 %v95_v30, %v91_v28  ;;  %v98_v33 = vadd.f32 %v93_v31, %v90_v29 }
  0x9c   :  { %394 = vrot.lane.b32.xlu0 %v922_v9, %s838_s9  ;;  %735 = vrot.lane.b32.xlu1 %v912_v7, %s823_s19 }
  0x9e   :  { %v671_v34 = vpop.permute.xlu0 %670  ;;  %v297_v35 = vpop.permute.xlu1 %296 }
  0x9f   :  { %v744_v39 = vadd.high.f32.bf16 %v904_v6, %v671_v34  ;;  %v745_v42 = vadd.low.f32.bf16 %v901_v5, %v671_v34  ;;  %v302_v44 = vadd.f32 %v297_v35, %v916_v8 }
  0xa0   :  { %400 = vrot.lane.b32.xlu0 %v916_v8, %s823_s19  ;;  %402 = vrot.lane.b32.xlu1 %v922_v9, %s823_s19 }
  0xa2   :  { %v299_v36 = vpop.permute.xlu0 %298  ;;  %v101_v37 = vpop.permute.xlu1 %100 }
  0xa3   :  { %v106_v38 = vadd.f32 %v101_v37, %v98_v33  ;;  %v303_v45 = vadd.f32 %v299_v36, %v922_v9  ;;  %v418_v33 = vlaneseq }
  0xa4   :  { %740 = vrot.lane.b32.xlu0 %v912_v7, %s839_s10  ;;  %408 = vrot.lane.b32.xlu1 %v916_v8, %s839_s10 }
  0xa6   :  { %v103_v40 = vpop.permute.xlu0 %102  ;;  %v676_v41 = vpop.permute.xlu1 %675 }
  0xa7   :  { %v107_v43 = vadd.f32 %v103_v40, %v99_v32  ;;  %v746_v46 = vadd.high.f32.bf16 %v744_v39, %v676_v41  ;;  %v747_v47 = vadd.low.f32.bf16 %v745_v42, %v676_v41  ;;  %v840_v39 = vmov 1966171168  }
  0xa8   :  { %410 = vrot.lane.b32.xlu0 %v922_v9, %s839_s10  ;;  %v428_v40 = vunpack.c.l.s4 %v840_v39 }
  0xaa   :  { %v305_v48 = vpop.permute.xlu0 %304  ;;  %v307_v49 = vpop.permute.xlu1 %306 }
  0xab   :  { %v310_v50 = vadd.f32 %v305_v48, %v302_v44  ;;  %v311_v51 = vadd.f32 %v307_v49, %v303_v45  ;;  %v1088_v44 = vshrl.u32 %v418_v33, 7 }
  0xad   :  { %vm421_vm2 = vcmp.lt.s32.totalorder %v1088_v44, 2 }
  0xae   :  { %v109_v52 = vpop.permute.xlu0 %108  ;;  %v111_v53 = vpop.permute.xlu1 %110 }
  0xaf   :  { %v114_v27 = vadd.f32 %v109_v52, %v106_v38  ;;  %v115_v28 = vadd.f32 %v111_v53, %v107_v43 }
  0xb2   :  { %v681_v54 = vpop.permute.xlu0 %680  ;;  %v313_v55 = vpop.permute.xlu1 %312 }
  0xb3   :  { %v318_v56 = vadd.f32 %v313_v55, %v310_v50  ;;  %v748_v57 = vadd.low.f32.bf16 %v747_v47, %v681_v54  ;;  %v749_v58 = vadd.high.f32.bf16 %v746_v46, %v681_v54  ;;  %v429_v47 = vunpack.c.0.s8 %v428_v40 }
  0xb4   :  { %v1094_v50 = vsub.s32 1, %v1088_v44 }
  0xb6   :  { %v315_v59 = vpop.permute.xlu0 %314  ;;  %v117_v60 = vpop.permute.xlu1 %116 }
  0xb7   :  { %v319_v61 = vadd.f32 %v315_v59, %v311_v51  ;;  %v122_v31 = vadd.f32 %v117_v60, %v114_v27  ;;  %v841_v51 = vmov 0   ;;  %v1104_v59 = vsub.s32 %v429_v47, %v1088_v44 }
  0xb8   :  { %v1099_v52 = vsel %vm421_vm2, 1, %v841_v51  ;;  %31 = vst.msk [vmem:[#allocation5] sm:$0xf] %vm30_vm6, %v841_v51 }
  0xb9   :  { %v518_v55 = vrot.slane %v1099_v52, %v1094_v50 }
  0xba   :  { %v119_v62 = vpop.permute.xlu0 %118  ;;  %v686_v63 = vpop.permute.xlu1 %685 }
  0xbb   :  { %v1051_v0 = vadd.low.f32.bf16 %v748_v57, %v686_v63  ;;  %v1053_v1 = vadd.high.f32.bf16 %v749_v58, %v686_v63  ;;  %v123_v32 = vadd.f32 %v119_v62, %v115_v28  ;;  %vm520_vm7 = vcmp.ne.s32.totalorder %v518_v55, 0 }
  0xbe   :  { %v321_v2 = vpop.permute.xlu0 %320  ;;  %v323_v3 = vpop.permute.xlu1 %322 }
  0xbf   :  { %v1055_v5 = vadd.f32 %v321_v2, %v318_v56  ;;  %v1057_v6 = vadd.f32 %v323_v3, %v319_v61  ;;  %v1107_v2 = vsub.s32 0, %v1088_v44 }
  0xc2   :  { %v125_v7 = vpop.permute.xlu0 %124  ;;  %v127_v8 = vpop.permute.xlu1 %126 }
  0xc3   :  { %v130_v34 = vadd.f32 %v125_v7, %v122_v31  ;;  %v131_v35 = vadd.f32 %v127_v8, %v123_v32  ;;  %v514_v7 = vrot.slane %v1099_v52, %v1107_v2 }
  0xc5   :  { %vm519_vm8 = vcmp.ne.s32.totalorder %v514_v7, 0 }
  0xc6   :  { %v1059_v9 = vpop.permute.xlu0 %690  ;;  %v1061_v10 = vpop.permute.xlu1 %328 }
  0xc7   :  { %v334_v39 = vadd.f32 %v1061_v10, %v1055_v5 }
  0xca   :  { %v1063_v11 = vpop.permute.xlu0 %330  ;;  %v133_v12 = vpop.permute.xlu1 %132 }
  0xcb   :  { %v138_v41 = vadd.f32 %v133_v12, %v130_v34  ;;  %v752_v34 = vadd.low.f32.bf16 %v1051_v0, %v1059_v9  ;;  %v335_v40 = vadd.f32 %v1063_v11, %v1057_v6 }
  0xce   :  { %v135_v13 = vpop.permute.xlu0 %134  ;;  %v1065_v14 = vpop.permute.xlu1 %695 }
  0xcf   :  { %v139_v42 = vadd.f32 %v135_v13, %v131_v35  ;;  %v753_v35 = vadd.high.f32.bf16 %v1053_v1, %v1059_v9 }
  0xd1   :  { %v755_v47 = vadd.high.f32.bf16 %v753_v35, %v1065_v14 }
  0xd2   :  { %v1067_v15 = vpop.permute.xlu0 %336  ;;  %v1069_v16 = vpop.permute.xlu1 %338 }
  0xd3   :  { %v342_v0 = vadd.f32 %v1067_v15, %v334_v39  ;;  %v343_v1 = vadd.f32 %v1069_v16, %v335_v40 }
  0xd6   :  { %v141_v17 = vpop.permute.xlu0 %140  ;;  %v143_v18 = vpop.permute.xlu1 %142 }
  0xd7   :  { %v146_v38 = vadd.f32 %v141_v17, %v138_v41  ;;  %v147_v43 = vadd.f32 %v143_v18, %v139_v42 }
  0xda   :  { %v1071_v19 = vpop.permute.xlu0 %700  ;;  %v1073_v20 = vpop.permute.xlu1 %344 }
  0xdb   :  { %v757_v6 = vadd.high.f32.bf16 %v755_v47, %v1071_v19  ;;  %v350_v9 = vadd.f32 %v1073_v20, %v342_v0 }
  0xde   :  { %v1075_v21 = vpop.permute.xlu0 %346  ;;  %v149_v22 = vpop.permute.xlu1 %148 }
  0xdf   :  { %v154_v48 = vadd.f32 %v149_v22, %v146_v38  ;;  %v351_v10 = vadd.f32 %v1075_v21, %v343_v1 }
  0xe2   :  { %v151_v23 = vpop.permute.xlu0 %150  ;;  %v1077_v24 = vpop.permute.xlu1 %705 }
  0xe3   :  { %v155_v49 = vadd.f32 %v151_v23, %v147_v43 }
  0xe6   :  { %v1079_v25 = vpop.permute.xlu0 %352  ;;  %v1081_v26 = vpop.permute.xlu1 %354 }
  0xe7   :  { %v358_v15 = vadd.f32 %v1079_v25, %v350_v9  ;;  %v359_v16 = vadd.f32 %v1081_v26, %v351_v10 }
  0xea   :  { %v157_v29 = vpop.permute.xlu0 %156  ;;  %v159_v30 = vpop.permute.xlu1 %158 }
  0xeb   :  { %v162_v53 = vadd.f32 %v157_v29, %v154_v48  ;;  %v163_v54 = vadd.f32 %v159_v30, %v155_v49 }
  0xee   :  { %v1083_v36 = vpop.permute.xlu0 %710  ;;  %v1085_v37 = vpop.permute.xlu1 %360 }
  0xf2   :  { %v1090_v45 = vpop.permute.xlu0 %362  ;;  %v165_v46 = vpop.permute.xlu1 %164 }
  0xf3   :  { %v170_v58 = vadd.f32 %v165_v46, %v162_v53  ;;  %v754_v46 = vadd.low.f32.bf16 %v752_v34, %v1065_v14  ;;  %v759_v14 = vadd.high.f32.bf16 %v757_v6, %v1077_v24  ;;  %v367_v20 = vadd.f32 %v1090_v45, %v359_v16 }
  0xf5   :  { %v756_v5 = vadd.low.f32.bf16 %v754_v46, %v1071_v19  ;;  %v366_v19 = vadd.f32 %v1085_v37, %v358_v15 }
  0xf6   :  { %v167_v56 = vpop.permute.xlu0 %166  ;;  %v716_v57 = vpop.permute.xlu1 %715 }
  0xf7   :  { %v171_v60 = vadd.f32 %v167_v56, %v163_v54  ;;  %v758_v49 = vadd.low.f32.bf16 %v756_v5, %v1077_v24  ;;  %v761_v54 = vadd.high.f32.bf16 %v759_v14, %v1083_v36 }
  0xf9   :  { %v426_v61 = vcombine.low %v170_v58, %v171_v60  ;;  %v760_v53 = vadd.low.f32.bf16 %v758_v49, %v1083_v36  ;;  %v763_v60 = vadd.high.f32.bf16 %v761_v54, %v716_v57 }
  0xfa   :  { %v369_v62 = vpop.permute.xlu0 %368  ;;  %v371_v63 = vpop.permute.xlu1 %370 }
  0xfb   :  { %v433_v3 = vrot.slane %v426_v61, %v1104_v59  ;;  %v762_v58 = vadd.low.f32.bf16 %v760_v53, %v716_v57  ;;  %v374_v61 = vadd.f32 %v369_v62, %v366_v19 }
  0xfd   :  { %v440_v8 = vrot.slane %v433_v3, %v1104_v59  ;;  %v375_v3 = vadd.f32 %v371_v63, %v367_v20 }
  0xfe   :  { %v721_v12 = vpop.permute.xlu0 %720  ;;  %v377_v13 = vpop.permute.xlu1 %376 }
  0xff   :  { %v442_v17 = vsel %vm421_vm2, %v440_v8, 0.0  ;;  %v764_v8 = vadd.low.f32.bf16 %v762_v58, %v721_v12  ;;  %v765_v24 = vadd.high.f32.bf16 %v763_v60, %v721_v12 }
 0x100   :  { %v548_v18 = vrot.slane %v442_v17, %v1094_v50  ;;  %v541_v22 = vrot.slane %v442_v17, %v1107_v2  ;;  %vm481_vm3 = vcmp.gt.f32.partialorder %v442_v17, 4.0  ;;  %vm483_vm4 = vcmp.gt.f32.partialorder %v442_v17, 8.0 }
 0x101   :  { %v482_v23 = vsel %vm481_vm3, 1, %v841_v51  ;;  %v484_v27 = vsel %vm483_vm4, 1, %v841_v51  ;;  %vm486_vm5 = vcmp.gt.f32.partialorder %v442_v17, 12.0  ;;  %v382_v17 = vadd.f32 %v377_v13, %v374_v61 }
 0x102   :  { %v379_v28 = vpop.permute.xlu0 %378  ;;  %550 = vbcast.lane.b32.xlu0 %v548_v18, 256  ;;  %543 = vbcast.lane.b32.xlu1 %v541_v22, 256  ;;  %v726_v29 = vpop.permute.xlu1 %725  ;;  %v485_v30 = vadd.s32 %v484_v27, %v482_v23  ;;  %v487_v31 = vsel %vm486_vm5, 1, %v841_v51 }
 0x103   :  { %v383_v25 = vadd.f32 %v379_v28, %v375_v3  ;;  %v766_v22 = vadd.low.f32.bf16 %v764_v8, %v726_v29  ;;  %v767_v23 = vadd.high.f32.bf16 %v765_v24, %v726_v29 }
 0x104   :  { %v488_v32 = vadd.s32 %v487_v31, %v485_v30 }
 0x106   :  { %v385_v41 = vpop.permute.xlu0 %384  ;;  %v387_v42 = vpop.permute.xlu1 %386  ;;  %v501_v38 = vrot.slane %v488_v32, %v1094_v50  ;;  %v494_v43 = vrot.slane %v488_v32, %v1107_v2 }
 0x107   :  { %v390_v27 = vadd.f32 %v385_v41, %v382_v17  ;;  %v391_v36 = vadd.f32 %v387_v42, %v383_v25 }
 0x108   :  { %503 = vbcast.lane.b32.xlu0 %v501_v38, 256  ;;  %496 = vbcast.lane.b32.xlu1 %v494_v43, 256 }
 0x10a   :  { %v731_v11 = vpop.permute.xlu0 %730  ;;  %v393_v48 = vpop.permute.xlu1 %392 }
 0x10b   :  { %v768_v30 = vadd.low.f32.bf16 %v766_v22, %v731_v11  ;;  %v769_v37 = vadd.high.f32.bf16 %v767_v23, %v731_v11  ;;  %v398_v31 = vadd.f32 %v393_v48, %v390_v27  ;;  %v490_v11 = vand.u32 127, %v418_v33 }
 0x10e   :  { %v395_v56 = vpop.permute.xlu0 %394  ;;  %v736_v21 = vpop.permute.xlu1 %735 }
 0x10f   :  { %v399_v45 = vadd.f32 %v395_v56, %v391_v36  ;;  %v770_v34 = vadd.low.f32.bf16 %v768_v30, %v736_v21  ;;  %v771_v35 = vadd.high.f32.bf16 %v769_v37, %v736_v21 }
 0x112   :  { %v401_v18 = vpop.permute.xlu0 %400  ;;  %v403_v26 = vpop.permute.xlu1 %402 }
 0x113   :  { %v406_v62 = vadd.f32 %v401_v18, %v398_v31  ;;  %v407_v63 = vadd.f32 %v403_v26, %v399_v45 }
 0x116   :  { %v741_v32 = vpop.permute.xlu0 %740  ;;  %v409_v57 = vpop.permute.xlu1 %408 }
 0x117   :  { %v772_v39 = vadd.low.f32.bf16 %v770_v34, %v741_v32  ;;  %v773_v12 = vadd.high.f32.bf16 %v771_v35, %v741_v32  ;;  %v414_v40 = vadd.f32 %v409_v57, %v406_v62 }
 0x119   :  { %v445_v28 = vcombine.low %v772_v39, %v773_v12 }
 0x11a   :  { %v411_v13 = vpop.permute.xlu0 %410 }
 0x11b   :  { %v415_v38 = vadd.f32 %v411_v13, %v407_v63  ;;  %v452_v29 = vrot.slane %v445_v28, %v1104_v59 }
 0x11d   :  { %v464_v43 = vcombine.low %v414_v40, %v415_v38  ;;  %v459_v42 = vrot.slane %v452_v29, %v1104_v59 }
 0x11f   :  { %v471_v41 = vrot.slane %v464_v43, %v1104_v59  ;;  %v461_v46 = vsel %vm421_vm2, %v459_v42, 0.0 }
 0x120   :  { %v574_v0 = vrot.slane %v461_v46, %v1094_v50  ;;  %v567_v1 = vrot.slane %v461_v46, %v1107_v2 }
 0x121   :  { %v478_v47 = vrot.slane %v471_v41, %v1104_v59 }
 0x122   :  { %576 = vbcast.lane.b32.xlu0 %v574_v0, 256  ;;  %569 = vbcast.lane.b32.xlu1 %v567_v1, 256 }
 0x123   :  { %v480_v5 = vsel %vm421_vm2, %v478_v47, 0.0 }
 0x124   :  { %v600_v6 = vrot.slane %v480_v5, %v1094_v50  ;;  %v593_v9 = vrot.slane %v480_v5, %v1107_v2 }
 0x126   :  { %602 = vbcast.lane.b32.xlu0 %v600_v6, 256  ;;  %595 = vbcast.lane.b32.xlu1 %v593_v9, 256  ;;  %v622_v9 = vld [vmem:[#allocation5] sm:$0xf] }
 0x174   :  { %v551_v59 = vpop.permute.xlu0 %550  ;;  %v544_v10 = vpop.permute.xlu1 %543 }
 0x17a   :  { %v504_v44 = vpop.permute.xlu0 %503  ;;  %v497_v48 = vpop.permute.xlu1 %496 }
 0x17b   :  { %vm506_vm10 = vcmp.eq.s32.totalorder %v490_v11, %v504_v44  ;;  %vm505_vm11 = vcmp.eq.s32.totalorder %v490_v11, %v497_v48 }
 0x17c   :  { %v645_v49 = vsel %vm506_vm10, 1.0, %v830_v4  ;;  %v644_v51 = vsel %vm505_vm11, 1.0, %v830_v4 }
 0x17d   :  { %v526_v14 = vsel %vm520_vm7, %v645_v49, 0.0  ;;  %v525_v15 = vsel %vm519_vm8, %v644_v51, 0.0 }
 0x17e   :  { %v529_v33 = vsel %vm527_vm9, %v526_v14, 0.0  ;;  %v553_v16 = vmul.f32 %v551_v59, %v526_v14  ;;  %v528_v50 = vsel %vm527_vm9, %v525_v15, 0.0  ;;  %v552_v55 = vmul.f32 %v544_v10, %v525_v15 }
 0x17f   :  { %v530_v53 = vadd.f32 %v529_v33, %v528_v50 }
 0x180   :  { %v555_v52 = vsel %vm527_vm9, %v553_v16, 0.0  ;;  %v554_v2 = vsel %vm527_vm9, %v552_v55, 0.0 }
 0x181   :  { %v531_v7 = vsel %vm527_vm9, %v530_v53, 0.0  ;;  %v556_v54 = vadd.f32 %v555_v52, %v554_v2 }
 0x182   :  { %v532_v19 = vrot.slane %v531_v7, 4 }
 0x183   :  { %v557_v20 = vsel %vm527_vm9, %v556_v54, 0.0 }
 0x184   :  { %v533_v4 = vadd.f32 %v532_v19, %v531_v7  ;;  %v558_v56 = vrot.slane %v557_v20, 4 }
 0x186   :  { %v534_v21 = vrot.slane %v533_v4, 2  ;;  %v559_v58 = vadd.f32 %v558_v56, %v557_v20 }
 0x188   :  { %v535_v60 = vadd.f32 %v534_v21, %v533_v4  ;;  %v560_v61 = vrot.slane %v559_v58, 2 }
 0x18a   :  { %v536_v3 = vrot.slane %v535_v60, 1  ;;  %v561_v8 = vadd.f32 %v560_v61, %v559_v58 }
 0x18c   :  { %v562_v24 = vrot.slane %v561_v8, 1  ;;  %v537_v17 = vadd.f32 %v536_v3, %v535_v60 }
 0x18e   :  { %v563_v25 = vadd.f32 %v562_v24, %v561_v8 }
 0x190   :  { %v617_v18 = vsel %vm616_vm12, %v537_v17, %v563_v25 }
 0x194   :  { %v577_v26 = vpop.permute.xlu0 %576  ;;  %v570_v22 = vpop.permute.xlu1 %569 }
 0x195   :  { %v579_v23 = vmul.f32 %v577_v26, %v526_v14  ;;  %v578_v27 = vmul.f32 %v570_v22, %v525_v15 }
 0x197   :  { %v581_v36 = vsel %vm527_vm9, %v579_v23, 0.0  ;;  %v580_v30 = vsel %vm527_vm9, %v578_v27, 0.0 }
 0x198   :  { %v582_v37 = vadd.f32 %v581_v36, %v580_v30  ;;  %v603_v31 = vpop.permute.xlu0 %602  ;;  %v596_v45 = vpop.permute.xlu1 %595 }
 0x199   :  { %v605_v32 = vmul.f32 %v603_v31, %v526_v14  ;;  %v604_v34 = vmul.f32 %v596_v45, %v525_v15 }
 0x19a   :  { %v583_v35 = vsel %vm527_vm9, %v582_v37, 0.0 }
 0x19b   :  { %v584_v57 = vrot.slane %v583_v35, 4  ;;  %v607_v62 = vsel %vm527_vm9, %v605_v32, 0.0  ;;  %v606_v63 = vsel %vm527_vm9, %v604_v34, 0.0 }
 0x19c   :  { %v608_v39 = vadd.f32 %v607_v62, %v606_v63 }
 0x19d   :  { %v585_v12 = vadd.f32 %v584_v57, %v583_v35 }
 0x19e   :  { %v609_v13 = vsel %vm527_vm9, %v608_v39, 0.0 }
 0x19f   :  { %v586_v28 = vrot.slane %v585_v12, 2  ;;  %v610_v40 = vrot.slane %v609_v13, 4 }
 0x1a1   :  { %v587_v38 = vadd.f32 %v586_v28, %v585_v12  ;;  %v611_v43 = vadd.f32 %v610_v40, %v609_v13 }
 0x1a3   :  { %v588_v29 = vrot.slane %v587_v38, 1  ;;  %v612_v41 = vrot.slane %v611_v43, 2 }
 0x1a5   :  { %v589_v42 = vadd.f32 %v588_v29, %v587_v38  ;;  %v613_v46 = vadd.f32 %v612_v41, %v611_v43 }
 0x1a7   :  { %v614_v47 = vrot.slane %v613_v46, 1  ;;  %v619_v0 = vsel %vm618_vm13, %v617_v18, %v589_v42 }
 0x1a9   :  { %v615_v1 = vadd.f32 %v614_v47, %v613_v46 }
 0x1ab   :  { %v621_v5 = vsel %vm620_vm14, %v619_v0, %v615_v1 }
 0x1ac   :  { %v646_v6 = vtrunc.f32 %v621_v5 }
 0x1ae   :  { %v647_v59 = vcvt.f32.s32 %v646_v6 }
 0x1b0   :  { %v624_v10 = vadd.s32 %v647_v59, %v622_v9 }
 0x1b2   :  { %626 = vst.msk [vmem:[#allocation5] sm:$0xf] %vm30_vm6, %v624_v10 }
 0x1b3   :  { %807 = shalt.err (!%p804_p12)
}
 0x1b4   :  { %s808_s16 = scalar_lea.hbm %s1196_s2, 64 }
 0x1b5   :  { %p809_p13 = scmp.ne.s32.totalorder %s1196_s2, %s808_s16  ;;  %p812_p0 = scmp.lt.u32.totalorder %s808_s16, %s1196_s2 }
 0x1b7   :  { %p814_p1 = pnand %p812_p0, %p809_p13 }
 0x1b9   :  { %817 = shalt.err (!%p814_p1)
}
 0x1ba   :  { %636 = dma.vmem_to_hbm [thread:$0]  %s634_s12, 64, %s1196_s2, [#allocation4]  }
 0x1bb   :  { %820 = dma.done.wait [#allocation4], 64  }
 0x1bc   :  { %821 = vsyncadd [#allocation4], 4294967232 }
 0x1bd   :  { %640 = vsyncpa [#allocation3], 1 }
 0x1be   :  { %641 = vsyncpa [#allocation4], 1 }

</bundles_post_ra>
